<compile_context>
chip_gen: v5e
topology: v5e:2x2
jax: 0.10.0
libtpu: 0.0.40
codegen_flags: <defaults>
</compile_context>

<pallas_src>
import jax
import jax.numpy as jnp
from jax.experimental import pallas as pl
from jax.experimental.pallas import tpu as pltpu


# --------------------------------------------------------------------------- prep
def _prep_kernel(e_ref, bp_ref, sup_ref, bias_ref):
    """Compute Chebyshev supports T_1..T_{K-1} and the node-adaptive bias once."""
    E = e_ref[...]                                   # (N, D) f32
    N = E.shape[0]
    K = sup_ref.shape[0] + 1                         # sup_ref holds T_1..T_{K-1}

    # supports = softmax(relu(E @ E.T), axis=1), kept in f32 for stability.
    logits = jnp.dot(E, E.T, preferred_element_type=jnp.float32)     # (N, N)
    logits = jnp.maximum(logits, 0.0)
    m = jnp.max(logits, axis=1, keepdims=True)
    ex = jnp.exp(logits - m)
    supports = ex / jnp.sum(ex, axis=1, keepdims=True)               # (N, N)

    sup_ref[0] = supports.astype(sup_ref.dtype)                      # T_1

    # Chebyshev recursion T_k = 2 A T_{k-1} - T_{k-2}; T_0 = I only used here.
    row = jax.lax.broadcasted_iota(jnp.int32, (N, N), 0)
    col = jax.lax.broadcasted_iota(jnp.int32, (N, N), 1)
    eye = (row == col).astype(jnp.float32)
    prev2, prev1 = eye, supports
    for k in range(2, K):
        nxt = jnp.dot(2.0 * supports, prev1,
                      preferred_element_type=jnp.float32) - prev2
        sup_ref[k - 1] = nxt.astype(sup_ref.dtype)
        prev2, prev1 = prev1, nxt

    # node-adaptive bias: (N, O)
    bias_ref[...] = jnp.dot(E, bp_ref[...], preferred_element_type=jnp.float32)


# --------------------------------------------------------------------------- gconv
def _gconv_kernel(sup_ref, wp2_ref, e_ref, bias_ref, x_ref, out_ref):
    K = sup_ref.shape[0] + 1
    N, D = e_ref.shape
    O = bias_ref.shape[1]
    C = wp2_ref.shape[0] // K
    TB = x_ref.shape[1] // C                         # batch elements in this tile
    mm_dtype = x_ref.dtype

    x_tile = x_ref[...]                              # (N, TB*C), matmul dtype
    wp2 = wp2_ref[...]                               # (K*C, D*O), matmul dtype
    E = e_ref[...]                                   # (N, D) f32
    bias = bias_ref[...]                             # (N, O) f32

    # Support matmuls with the batch folded into the RHS lanes (width TB*C).
    # k == 0 is the identity support, so x_tile is used directly (matmul skipped).
    xg = [x_tile]
    for k in range(1, K):
        xg_k = jnp.dot(sup_ref[k - 1], x_tile,
                       preferred_element_type=jnp.float32)           # (N, TB*C) f32
        xg.append(xg_k.astype(mm_dtype))

    # Per batch element of the tile: one MXU contraction against the reshaped
    # weight pool, then a small f32 VPU reduction over the embedding dim d.
    outs = []
    for b in range(TB):
        lo, hi = b * C, (b + 1) * C
        xg_b = jnp.concatenate([p[:, lo:hi] for p in xg], axis=1)     # (N, K*C)
        y_b = jnp.dot(xg_b, wp2, preferred_element_type=jnp.float32)  # (N, D*O) f32
        acc = bias
        for d in range(D):
            acc = acc + E[:, d:d + 1] * y_b[:, d * O:(d + 1) * O]
        outs.append(acc)

    out_ref[...] = jnp.concatenate(outs, axis=1)      # (N, TB*O) lane slab


# --------------------------------------------------------------------------- wrapper
def _pick_batch_tile(B, C, O, lane_budget=1024):
    """Largest divisor of B whose x / out lane slabs stay layout-legal (multiples of
    128) and modest; otherwise use the whole batch (block == full array is always legal)."""
    cands = [d for d in range(1, B)
             if B % d == 0
             and (d * C) % 128 == 0 and (d * O) % 128 == 0
             and d * C <= lane_budget and d * O <= lane_budget]
    return max(cands) if cands else B


def avwgcn(x, node_embeddings, weights_pool, bias_pool, matmul_dtype=jnp.bfloat16):
    B, N, C = x.shape
    D, K, C2, O = weights_pool.shape
    assert C2 == C, (C2, C)
    assert node_embeddings.shape == (N, D)
    assert bias_pool.shape == (D, O)
    assert K >= 2, "cheb_k must be >= 2 (Chebyshev recursion assumption of the module)"

    x = x.astype(jnp.float32)
    E = node_embeddings.astype(jnp.float32)
    Wp = weights_pool.astype(jnp.float32)
    bp = bias_pool.astype(jnp.float32)

    vmem = pl.BlockSpec(memory_space=pltpu.MemorySpace.VMEM)

    # ---- stage 1: supports + bias, computed exactly once ---------------------
    sup, bias = pl.pallas_call(
        _prep_kernel,
        out_shape=(jax.ShapeDtypeStruct((K - 1, N, N), matmul_dtype),
                   jax.ShapeDtypeStruct((N, O), jnp.float32)),
        in_specs=[vmem, vmem],
        out_specs=(vmem, vmem),
    )(E, bp)

    # ---- wrapper-side layout plumbing (done once, pure reshapes) -------------
    # x as (N, B*C): lane index = b*C + i  -> wide, batch-folded RHS.
    x2 = jnp.transpose(x, (1, 0, 2)).reshape(N, B * C).astype(matmul_dtype)
    # weights_pool as (K*C, D*O): row = k*C + i, col = d*O + o.
    wp2 = jnp.transpose(Wp, (1, 2, 0, 3)).reshape(K * C, D * O).astype(matmul_dtype)

    tb = _pick_batch_tile(B, C, O)
    grid = (B // tb,)

    # ---- VMEM budget: resident blocks + double-buffered tiles + working set --
    mm_bytes = jnp.dtype(matmul_dtype).itemsize
    est = ((K - 1) * N * N * mm_bytes                 # Chebyshev stack (resident)
           + K * C * D * O * mm_bytes                 # reshaped weight pool (resident)
           + N * (D + O) * 4                          # E, bias (resident)
           + 2 * N * tb * C * mm_bytes                # x tile (double-buffered)
           + 2 * N * tb * O * 4                       # out tile (double-buffered)
           + 4 * (K * N * tb * C + N * (K * C + D * O) + N * tb * O))  # in-kernel temps
    vmem_limit = int(min(max(4 * est, 16 * 1024 * 1024), 48 * 1024 * 1024))

    out2 = pl.pallas_call(
        _gconv_kernel,
        out_shape=jax.ShapeDtypeStruct((N, B * O), jnp.float32),
        grid=grid,
        in_specs=[
            pl.BlockSpec((K - 1, N, N), lambda t: (0, 0, 0)),   # supports (resident)
            pl.BlockSpec((K * C, D * O), lambda t: (0, 0)),     # weight pool (resident)
            pl.BlockSpec((N, D), lambda t: (0, 0)),             # E (resident)
            pl.BlockSpec((N, O), lambda t: (0, 0)),             # bias (resident)
            pl.BlockSpec((N, tb * C), lambda t: (0, t)),        # x batch tile (streamed)
        ],
        out_specs=pl.BlockSpec((N, tb * O), lambda t: (0, t)),  # lane-dense out slab
        compiler_params=pltpu.CompilerParams(
            dimension_semantics=("parallel",),
            vmem_limit_bytes=vmem_limit),
    )(sup, wp2, E, bias, x2)

    # (N, B*O) -> (B, N, O)
    return jnp.transpose(out2.reshape(N, B, O), (1, 0, 2))


# --------------------------------------------------------------------------- reference
def avwgcn_ref(x, E, Wp, bp):
    """Pure-JAX reference matching the PyTorch forward exactly (f32)."""
    N = E.shape[0]
    K = Wp.shape[1]
    supports = jax.nn.softmax(jax.nn.relu(E @ E.T), axis=1)
    sup_set = [jnp.eye(N, dtype=jnp.float32), supports]
    for _ in range(2, K):
        sup_set.append(2.0 * supports @ sup_set[-1] - sup_set[-2])
    sup = jnp.stack(sup_set, axis=0)                       # (K, N, N)
    weights = jnp.einsum('nd,dkio->nkio', E, Wp)           # (N, K, C, O)
    bias = E @ bp                                          # (N, O)
    x_g = jnp.einsum('knm,bmc->bknc', sup, x)              # (B, K, N, C)
    x_g = jnp.transpose(x_g, (0, 2, 1, 3))                 # (B, N, K, C)
    return jnp.einsum('bnki,nkio->bno', x_g, weights) + bias


if __name__ == "__main__":
    # Small shapes consistent with the module's forward.
    B, N, dim_in, dim_out, cheb_k, embed_dim = 2, 16, 4, 8, 3, 8

    key = jax.random.PRNGKey(0)
    k1, k2, k3, k4 = jax.random.split(key, 4)
    x = jax.random.normal(k1, (B, N, dim_in), dtype=jnp.float32)
    node_embeddings = jax.random.normal(k2, (N, embed_dim), dtype=jnp.float32)
    weights_pool = 0.1 * jax.random.normal(
        k3, (embed_dim, cheb_k, dim_in, dim_out), dtype=jnp.float32)
    bias_pool = 0.1 * jax.random.normal(k4, (embed_dim, dim_out), dtype=jnp.float32)

    out = avwgcn(x, node_embeddings, weights_pool, bias_pool)
    out = jax.block_until_ready(out)

    ref = avwgcn_ref(x, node_embeddings, weights_pool, bias_pool)
    assert out.shape == (B, N, dim_out), out.shape
    # bf16 MXU operands -> slightly relaxed tolerance vs the f32 reference.
    if not jnp.allclose(out, ref, atol=5e-2, rtol=5e-2):
        max_err = float(jnp.max(jnp.abs(out - ref)))
        raise AssertionError(f"Pallas kernel mismatch vs reference, max |err| = {max_err}")

    print("KERNEL_OK")
</pallas_src>

<mosaic_0001>
module attributes {stable_mosaic.version = 11 : i64} {
  func.func @_prep_kernel(%arg0: memref<16x8xf32, #tpu.memory_space<vmem>>, %arg1: memref<8x8xf32, #tpu.memory_space<vmem>>, %arg2: memref<2x16x16xbf16, #tpu.memory_space<vmem>>, %arg3: memref<16x8xf32, #tpu.memory_space<vmem>>) attributes {dimension_semantics = [], scalar_prefetch = 0 : i64, scratch_operands = 0 : i64, tpu.core_type = #tpu.core_type<tc>} {
    %c0 = arith.constant 0 : index
    %c0_0 = arith.constant 0 : index
    %0 = vector.load %arg0[%c0, %c0_0] : memref<16x8xf32, #tpu.memory_space<vmem>>, vector<16x8xf32>
    %1 = tpu.transpose %0, [1, 0] : vector<16x8xf32> -> vector<8x16xf32>
    %cst = arith.constant dense<0.000000e+00> : vector<16x16xf32>
    %2 = tpu.matmul %0, %1, %cst {dimension_numbers = #tpu.dot_dimension_numbers<[1], [0], [0], [1], [0, 0, 1, 1], [], []>} : vector<16x8xf32>, vector<8x16xf32>, vector<16x16xf32> -> vector<16x16xf32>
    %cst_1 = arith.constant 0.000000e+00 : f32
    %3 = vector.broadcast %cst_1 : f32 to vector<16x16xf32>
    %4 = arith.maximumf %2, %3 : vector<16x16xf32>
    %cst_2 = arith.constant dense<0xFF800000> : vector<16xf32>
    %5 = vector.multi_reduction <maximumf>, %4, %cst_2 [1] : vector<16x16xf32> to vector<16xf32>
    %6 = vector.shape_cast %5 : vector<16xf32> to vector<16x1xf32>
    %7 = vector.broadcast %6 : vector<16x1xf32> to vector<16x16xf32>
    %8 = arith.subf %4, %7 : vector<16x16xf32>
    %9 = math.exp %8 : vector<16x16xf32>
    %cst_3 = arith.constant dense<0.000000e+00> : vector<16xf32>
    %10 = vector.multi_reduction <add>, %9, %cst_3 [1] : vector<16x16xf32> to vector<16xf32>
    %11 = vector.shape_cast %10 : vector<16xf32> to vector<16x1xf32>
    %12 = vector.broadcast %11 : vector<16x1xf32> to vector<16x16xf32>
    %13 = arith.divf %9, %12 : vector<16x16xf32>
    %14 = arith.truncf %13 : vector<16x16xf32> to vector<16x16xbf16>
    %c0_4 = arith.constant 0 : index
    %c0_5 = arith.constant 0 : index
    %c0_6 = arith.constant 0 : index
    %15 = vector.load %arg2[%c0_4, %c0_5, %c0_6] : memref<2x16x16xbf16, #tpu.memory_space<vmem>>, vector<1x16x16xbf16>
    %16 = vector.shape_cast %15 : vector<1x16x16xbf16> to vector<16x16xbf16>
    %17 = vector.shape_cast %14 : vector<16x16xbf16> to vector<1x16x16xbf16>
    tpu.vector_store %arg2[%c0_4, %c0_5, %c0_6], %17 {strides = array<i32>} : memref<2x16x16xbf16, #tpu.memory_space<vmem>>, vector<1x16x16xbf16>,
    %18 = tpu.iota {dimensions = array<i32: 0>} : vector<16x16xi32>
    %19 = tpu.iota {dimensions = array<i32: 1>} : vector<16x16xi32>
    %20 = arith.cmpi eq, %18, %19 : vector<16x16xi32>
    %21 = arith.extui %20 : vector<16x16xi1> to vector<16x16xi32>
    %22 = arith.sitofp %21 : vector<16x16xi32> to vector<16x16xf32>
    %cst_7 = arith.constant 2.000000e+00 : f32
    %23 = vector.broadcast %cst_7 : f32 to vector<16x16xf32>
    %24 = arith.mulf %23, %13 : vector<16x16xf32>
    %cst_8 = arith.constant dense<0.000000e+00> : vector<16x16xf32>
    %25 = tpu.matmul %24, %13, %cst_8 {dimension_numbers = #tpu.dot_dimension_numbers<[1], [0], [0], [1], [0, 0, 1, 1], [], []>} : vector<16x16xf32>, vector<16x16xf32>, vector<16x16xf32> -> vector<16x16xf32>
    %26 = arith.subf %25, %22 : vector<16x16xf32>
    %27 = arith.truncf %26 : vector<16x16xf32> to vector<16x16xbf16>
    %c1 = arith.constant 1 : index
    %c0_9 = arith.constant 0 : index
    %c0_10 = arith.constant 0 : index
    %28 = vector.load %arg2[%c1, %c0_9, %c0_10] : memref<2x16x16xbf16, #tpu.memory_space<vmem>>, vector<1x16x16xbf16>
    %29 = vector.shape_cast %28 : vector<1x16x16xbf16> to vector<16x16xbf16>
    %30 = vector.shape_cast %27 : vector<16x16xbf16> to vector<1x16x16xbf16>
    tpu.vector_store %arg2[%c1, %c0_9, %c0_10], %30 {strides = array<i32>} : memref<2x16x16xbf16, #tpu.memory_space<vmem>>, vector<1x16x16xbf16>,
    %c0_11 = arith.constant 0 : index
    %c0_12 = arith.constant 0 : index
    %31 = vector.load %arg1[%c0_11, %c0_12] : memref<8x8xf32, #tpu.memory_space<vmem>>, vector<8x8xf32>
    %cst_13 = arith.constant dense<0.000000e+00> : vector<16x8xf32>
    %32 = tpu.matmul %0, %31, %cst_13 {dimension_numbers = #tpu.dot_dimension_numbers<[1], [0], [0], [1], [0, 0, 1, 1], [], []>} : vector<16x8xf32>, vector<8x8xf32>, vector<16x8xf32> -> vector<16x8xf32>
    %c0_14 = arith.constant 0 : index
    %c0_15 = arith.constant 0 : index
    %33 = vector.load %arg3[%c0_14, %c0_15] : memref<16x8xf32, #tpu.memory_space<vmem>>, vector<16x8xf32>
    tpu.vector_store %arg3[%c0_14, %c0_15], %32 {strides = array<i32>} : memref<16x8xf32, #tpu.memory_space<vmem>>, vector<16x8xf32>,
    return
  }
}

</mosaic_0001>

<bundles_post_ra>
// kernel: tpu_custom_call.1
= control target key start
LH: loop header
LB: loop body
LE: loop exit
PB: predicated region body
PF: predicated region fallthrough
CT: control target
= control target key end

     0   :  { %vm16_vm0 = vcmask 64512   ;;  %s311_s0 = inlined_call_operand.vmem [shape: f32[16,8], index: 0, kind: input, shape index: {}]   ;;  %s312_s1 = inlined_call_operand.vmem [shape: f32[8,8], index: 1, kind: input, shape index: {}]   ;;  %s313_s2 = inlined_call_operand.hbm [shape: bf16[2,16,16], index: 2, kind: output, shape index: {0}]   ;;  %s314_s3 = inlined_call_operand.vmem [shape: f32[16,8], index: 3, kind: output, shape index: {1}]  }
   0x1   :  { %v15_v0 = vld [vmem:[%s311_s0 + $0x8] sm:$0xff] }
   0x2   :  { %9 = vsyncpa [#allocation3], 0  ;;  %209 = vmatpush.xpose.msk.msra.mxu3 %vm16_vm0, %v15_v0  ;;  %199 = vmatpush.xpose.msk.msra.mxu0 %vm16_vm0, %v15_v0  ;;  %v14_v1 = vld [vmem:[%s311_s0] sm:$0xff]  ;;  %vm48_vm1 = vcmask 130048   ;;  %vm99_vm6 = vcmask 125952   ;;  %v102_v49 = vlaneseq  ;;  %v249_v52 = vmov 0.0  }
   0x3   :  { %v151_v18 = vld [vmem:[%s312_s1] sm:$0xff]  ;;  %s250_s20 = smov [#allocation2]   ;;  %s251_s24 = smov 64  }
   0x4   :  { %167 = vmatpush.msra.mxu2 %v151_v18  ;;  %v103_v50 = vshrl.u32 %v102_v49, 7  ;;  %v106_v51 = vand.u32 127, %v102_v49  ;;  %s181_s21 = sshll.u32 %s250_s20, 4  ;;  %s252_s25 = smov 4   ;;  %s182_s21 = int_to_ptr.vmem [resolvable:$true] %s181_s21 }
   0x5   :  { %207 = vmatmul.msk.f32.vlgmr.msra.gmra.mxu2 %vm16_vm0, %v14_v1 }
   0x6   :  { %210 = vmatpush.xpose.msk.msra.mxu3 %vm16_vm0, %v14_v1  ;;  %200 = vmatpush.xpose.msk.msra.mxu0 %vm16_vm0, %v14_v1  ;;  %vm107_vm11 = vcmp.eq.s32.totalorder %v103_v50, %v106_v51  ;;  %v104_v54 = vadd.s32 8, %v103_v50 }
   0x7   :  { %v203_v53 = vsel %vm107_vm11, 1.0, %v249_v52 }
   0x8   :  { %vm108_vm12 = vcmp.eq.s32.totalorder %v104_v54, %v106_v51 }
   0x9   :  { %202 = vmatmul.msk.f32.vlgmr.msra.gmra.mxu3 %vm16_vm0, %v15_v0  ;;  %201 = vmatmul.msk.f32.vlgmr.msra.gmra.mxu0 %vm16_vm0, %v14_v1  ;;  %v204_v58 = vsel %vm108_vm12, 1.0, %v249_v52 }
   0xd   :  { %208 = vmatmul.msk.f32.gmra.mxu2 %vm16_vm0, %v15_v0 }
  0x86   :  { %v40_v4 = vpop.f32.mrf.mxu0 }
  0x87   :  { %v46_v6 = vmax.f32 %v40_v4, 0.0 }
  0x88   :  { %v169_v47 = vpop.f32.mrf.mxu2 }
  0x89   :  { %v49_v7 = vsel %vm48_vm1, %v46_v6, -inf  ;;  %175 = vst.msk [vmem:[%s314_s3] sm:$0xff] %vm16_vm0, %v169_v47 }
  0x8c   :  { %v43_v2 = vpop.f32.mrf.mxu3 }
  0x8d   :  { %v47_v3 = vmax.f32 %v43_v2, 0.0 }
  0x8f   :  { %v52_v5 = vsel %vm48_vm1, %v47_v3, -inf }
  0x90   :  { %53 = vmax.xlane.f32.xlu0 %v52_v5  ;;  %v172_v48 = vpop.f32.mrf.mxu2 }
  0x91   :  { %176 = vst.msk [vmem:[%s314_s3 + $0x8] sm:$0xff] %vm16_vm0, %v172_v48  ;;  %s183_s3 = sshll.u32 %s313_s2, 4  ;;  %s184_s3 = int_to_ptr.hbm [resolvable:$true] %s183_s3 }
  0x98   :  { %50 = vmax.xlane.f32.xlu0 %v49_v7 }
 0x103   :  { %v54_v8 = vpop.xlane.xlu0 %53 }
 0x104   :  { %v56_v9 = vsub.f32 %v47_v3, %v54_v8 }
 0x106   :  { %v59_v10 = vmul.f32 1.442695, %v56_v9 }
 0x108   :  { %215 = vpow2.f32 %v59_v10 }
 0x10b   :  { %v51_v11 = vpop.xlane.xlu0 %50 }
 0x10c   :  { %v55_v12 = vsub.f32 %v46_v6, %v51_v11 }
 0x10e   :  { %v216_v13 = vpop.eup %215  ;;  %v57_v14 = vmul.f32 1.442695, %v55_v12 }
 0x10f   :  { %v64_v15 = vsel %vm48_vm1, %v216_v13, 0.0 }
 0x110   :  { %217 = vpow2.f32 %v57_v14  ;;  %65 = vadd.xlane.f32.xlu1 %v64_v15 }
 0x116   :  { %v218_v16 = vpop.eup %217 }
 0x117   :  { %v61_v17 = vsel %vm48_vm1, %v218_v16, 0.0 }
 0x118   :  { %62 = vadd.xlane.f32.xlu1 %v61_v17 }
 0x183   :  { %v66_v19 = vpop.xlane.xlu1 %65 }
 0x184   :  { %219 = vrcp.f32 %v66_v19  ;;  %v93_v24 = vand.u32 2147483648, %v66_v19  ;;  %v91_v26 = vand.u32 2147483647, %v66_v19  ;;  %vm87_vm3 = vweird.f32 %v66_v19 }
 0x186   :  { %v94_v29 = vor.u32 1.1754944e-38, %v93_v24  ;;  %vm92_vm5 = vcmp.eq.f32.partialorder %v91_v26, 8.507059e+37 }
 0x18a   :  { %v220_v20 = vpop.eup %219 }
 0x18b   :  { %v83_v21 = vmul.f32 %v220_v20, %v66_v19  ;;  %v63_v22 = vpop.xlane.xlu1 %62  ;;  %vm88_vm2 = vweird.f32 %v220_v20 }
 0x18c   :  { %221 = vrcp.f32 %v63_v22  ;;  %vm89_vm4 = vmor %vm87_vm3, %vm88_vm2  ;;  %v78_v35 = vand.u32 2147483648, %v63_v22  ;;  %v76_v37 = vand.u32 2147483647, %v63_v22  ;;  %vm72_vm8 = vweird.f32 %v63_v22 }
 0x18d   :  { %v84_v23 = vsub.f32 1.0, %v83_v21 }
 0x18e   :  { %v79_v40 = vor.u32 1.1754944e-38, %v78_v35  ;;  %vm77_vm10 = vcmp.eq.f32.partialorder %v76_v37, 8.507059e+37 }
 0x18f   :  { %v85_v25 = vmul.f32 %v220_v20, %v84_v23 }
 0x191   :  { %v86_v27 = vadd.f32 %v220_v20, %v85_v25 }
 0x192   :  { %v222_v28 = vpop.eup %221 }
 0x193   :  { %v68_v30 = vmul.f32 %v222_v28, %v63_v22  ;;  %v90_v31 = vsel %vm89_vm4, %v220_v20, %v86_v27  ;;  %vm73_vm7 = vweird.f32 %v222_v28 }
 0x194   :  { %v95_v32 = vsel %vm92_vm5, %v94_v29, %v90_v31  ;;  %vm74_vm9 = vmor %vm72_vm8, %vm73_vm7 }
 0x195   :  { %v69_v33 = vsub.f32 1.0, %v68_v30  ;;  %v96_v34 = vmul.f32 %v216_v13, %v95_v32 }
 0x197   :  { %v70_v36 = vmul.f32 %v222_v28, %v69_v33  ;;  %v98_v38 = vpack.c.bf16 %v96_v34, %v96_v34  ;;  %135 = vmatpush.msra.mxu1 %v96_v34  ;;  %v114_v46 = vmul.f32 2.0, %v96_v34 }
 0x199   :  { %v71_v39 = vadd.f32 %v222_v28, %v70_v36  ;;  %101 = vst.msk [vmem:[#allocation2 + $0x4] sm:$0xf] %vm99_vm6, %v98_v38 }
 0x19b   :  { %v75_v41 = vsel %vm74_vm9, %v222_v28, %v71_v39 }
 0x19c   :  { %v80_v42 = vsel %vm77_vm10, %v79_v40, %v75_v41 }
 0x19d   :  { %v81_v43 = vmul.f32 %v218_v16, %v80_v42 }
 0x19f   :  { %v97_v44 = vpack.c.bf16 %v81_v43, %v81_v43  ;;  %136 = vmatpush.msra.mxu1 %v81_v43  ;;  %v113_v45 = vmul.f32 2.0, %v81_v43 }
 0x1a1   :  { %205 = vmatmul.msk.f32.vlgmr.msra.gmra.mxu1 %vm48_vm1, %v113_v45  ;;  %100 = vst.msk [vmem:[#allocation2] sm:$0xf] %vm99_vm6, %v97_v44 }
 0x1a9   :  { %206 = vmatmul.msk.f32.gmra.mxu1 %vm48_vm1, %v114_v46 }
 0x21e   :  { %v138_v55 = vpop.f32.mrf.mxu1 }
 0x21f   :  { %v144_v56 = vsub.f32 %v138_v55, %v203_v53 }
 0x221   :  { %v146_v57 = vpack.c.bf16 %v144_v56, %v144_v56 }
 0x223   :  { %149 = vst.msk [vmem:[#allocation2 + $0x8] sm:$0xf] %vm99_vm6, %v146_v57 }
 0x226   :  { %v141_v59 = vpop.f32.mrf.mxu1 }
 0x227   :  { %v145_v60 = vsub.f32 %v141_v59, %v204_v58 }
 0x229   :  { %v147_v61 = vpack.c.bf16 %v145_v60, %v145_v60 }
 0x22b   :  { %150 = vst.msk [vmem:[#allocation2 + $0xc] sm:$0xf] %vm99_vm6, %v147_v61 }
 0x22c   :  { %189 = dma.vmem_to_hbm [thread:$0]  %s182_s21, 256, %s184_s3, [#allocation3], %s251_s24, %s251_s24, %s252_s25  }
 0x22d   :  { %247 = dma.done.wait [#allocation3], 256  }
 0x22e   :  { %248 = vsyncadd [#allocation3], 4294967040 }
 0x22f   :  { %198 = vsyncpa [#allocation3], 1 }

</bundles_post_ra>
